<compile_context>
chip_gen: v7x
topology: tpu7x:2x2x1
jax: 0.10.0
libtpu: 0.0.40
codegen_flags: <defaults>
</compile_context>

<pallas_src>
from functools import partial

import jax
import jax.numpy as jnp
from jax import lax
from jax.experimental import pallas as pl
from jax.experimental.pallas import tpu as pltpu

LRELU_SLOPE = 0.2


def _cdiv(a, b):
    return -(-a // b)


# ----------------------------- Pallas kernel --------------------------------
def _mdc_kernel(x_ref, w_ref, b_ref, o_ref, *, n_frame_taps, tile_frames):
    """One grid step = one (batch, tile of output frames).

    x_ref : (tile_frames + n_frame_taps - 1, F*Cin)  bf16 haloed input frames
    w_ref : (n_frame_taps, F*Cin, OPF*Cout)          bf16 block-Toeplitz weights
    b_ref : (1, OPF*Cout)                            f32  combined bias
    o_ref : (tile_frames, OPF*Cout)                  f32  output frames
    """
    acc = jnp.dot(x_ref[0:tile_frames, :], w_ref[0],
                  preferred_element_type=jnp.float32)
    for t in range(1, n_frame_taps):          # static unroll (tiny, == 2 here)
        acc += jnp.dot(x_ref[t:t + tile_frames, :], w_ref[t],
                       preferred_element_type=jnp.float32)
    acc += b_ref[...]
    o_ref[...] = jnp.where(acc >= 0.0, acc, LRELU_SLOPE * acc).astype(o_ref.dtype)


# ---------------------- parameter packing (wrapper-side) ---------------------
def pack_mdc_params(torch_params, *, kernel_size, stride, dilations):
    """Fold branches + mean + biases + proj conv into block-Toeplitz frame
    weights for the kernel."""
    w_dil, b_dil, w_proj, b_proj = torch_params        # torch OIH-style layouts
    nd, cout, cin, K = w_dil.shape
    assert K % 2 == 1, "branch outputs only align for odd kernel_size"
    s = int(stride)

    pads = [d * (K - 1) // 2 for d in dilations]
    pad_l = max(pads)
    dw = max(pad_l - p + (K - 1) * d for d, p in zip(dilations, pads)) + 1

    # dense "equivalent" stage-1 kernel: D[o] in R^{Cout x Cin}
    D = jnp.zeros((dw, cout, cin), jnp.float32)
    for i, (d, p) in enumerate(zip(dilations, pads)):
        for k in range(K):
            D = D.at[pad_l - p + k * d].add(w_dil[i, :, :, k] / nd)
    b1 = jnp.mean(b_dil, axis=0)                        # (cout,)

    # fold the 3-tap proj conv through stage 1:  C[m] = sum_{u+o=m} P_u @ D[o]
    n_comb = dw + 2
    C = jnp.zeros((n_comb, cout, cin), jnp.float32)
    for u in range(3):
        C = C.at[u:u + dw].add(jnp.einsum('ab,obc->oac', w_proj[:, :, u], D))
    b_comb = b_proj + jnp.sum(w_proj, axis=2) @ b1      # (cout,)

    # frame (block-Toeplitz) re-blocking: F input rows -> OPF output positions
    opf = max(1, 128 // max(s * cin, 1))                # outputs per frame
    F = opf * s                                         # input rows per frame
    fc = F * cin                                        # input lanes per frame
    ow = opf * cout                                     # output lanes per frame
    nft = 1 + _cdiv(max(n_comb - s, 0), F)              # frame taps (2 here)

    t_i, r_i, p_i = jnp.meshgrid(jnp.arange(nft), jnp.arange(F),
                                 jnp.arange(opf), indexing='ij')
    m_i = t_i * F + r_i - p_i * s                       # combined-tap index
    valid = (m_i >= 0) & (m_i < n_comb)
    Cg = C[jnp.clip(m_i, 0, n_comb - 1)]                # (nft, F, opf, cout, cin)
    Cg = jnp.where(valid[..., None, None], Cg, 0.0)
    w_f = jnp.transpose(Cg, (0, 1, 4, 2, 3)).reshape(nft, fc, ow)
    w_f = w_f.astype(jnp.bfloat16)
    b_f = jnp.tile(b_comb, opf)[None, :].astype(jnp.float32)      # (1, ow)

    meta = dict(kernel_size=K, stride=s, dilations=tuple(dilations),
                cin=int(cin), cout=int(cout), pad_l=int(pad_l), dw=int(dw),
                n_comb=int(n_comb), opf=int(opf), frame=int(F), fc=int(fc),
                ow=int(ow), nft=int(nft), shift=int(pad_l + 1),
                dense_taps=D, b1=b1, w_proj=w_proj, b_proj=b_proj)
    return (w_f, b_f), meta


# ------------------- exact boundary columns (wrapper patch) ------------------
def _patch_boundaries(y, x32_nlc, meta, L, lout):
    """The proj conv zero-pads h (not x): recompute the <=2 affected output
    columns exactly (f32, module semantics) and overwrite them."""
    D, b1 = meta["dense_taps"], meta["b1"]
    wp, bp = meta["w_proj"], meta["b_proj"]
    pad_l, dw, s, cout = meta["pad_l"], meta["dw"], meta["stride"], meta["cout"]
    B = x32_nlc.shape[0]

    def h_at(t):                                        # h[t], t in [0, L)
        acc = jnp.broadcast_to(b1, (B, cout))
        for o in range(dw):
            r = t + o - pad_l
            if 0 <= r < L:
                acc = acc + x32_nlc[:, r, :] @ D[o].T
        return acc

    def out_at(j):
        acc = jnp.broadcast_to(bp, (B, cout))
        for u in range(3):
            t = j * s - 1 + u
            if 0 <= t < L:
                acc = acc + h_at(t) @ wp[:, :, u].T
        return jnp.where(acc >= 0.0, acc, LRELU_SLOPE * acc)

    y = y.at[:, 0, :].set(out_at(0))
    if lout > 1:
        y = y.at[:, lout - 1, :].set(out_at(lout - 1))
    return y


# ------------------------------- wrapper -------------------------------------
def mdc_forward(x_ncl, packed_params, meta, *, tile_frames=128):
    """x_ncl: (B, Cin, L) PyTorch NCL layout. Returns (B, Cout, Lout)."""
    w_f, b_f = packed_params
    B, cin, L = x_ncl.shape
    assert cin == meta["cin"]
    s, cout = meta["stride"], meta["cout"]
    opf, F, fc, ow = meta["opf"], meta["frame"], meta["fc"], meta["ow"]
    nft, shift = meta["nft"], meta["shift"]

    lout = (L - 1) // s + 1                             # proj conv output length
    n_of = _cdiv(lout, opf)                             # output frames
    tf = max(8, (int(tile_frames) // 8) * 8)
    to = min(tf, n_of)                                  # frames per grid step
    nt = _cdiv(n_of, to)
    n_of_pad = nt * to
    win = to + nft - 1                                  # haloed frames per step
    n_xf = max(n_of_pad + nft - 1, _cdiv(shift + L, F)) # total input frames

    # layout glue: NCL -> time-major NLC bf16, pad once, frame, halo-gather
    # (halo duplication is (to+1)/to ~ 1-3%)
    x_nlc = jnp.transpose(x_ncl, (0, 2, 1)).astype(jnp.bfloat16)
    x_pad = jnp.pad(x_nlc, ((0, 0), (shift, n_xf * F - shift - L), (0, 0)))
    x_framed = x_pad.reshape(B, n_xf, fc)
    idx = (jnp.arange(nt) * to)[:, None] + jnp.arange(win)[None, :]
    x_tiles = x_framed[:, idx, :]                       # (B, nt, win, fc)

    kernel = partial(_mdc_kernel, n_frame_taps=nft, tile_frames=to)
    out = pl.pallas_call(
        kernel,
        out_shape=jax.ShapeDtypeStruct((B, n_of_pad, ow), jnp.float32),
        grid=(B, nt),
        in_specs=[
            pl.BlockSpec((None, None, win, fc), lambda b, i: (b, i, 0, 0)),  # x
            pl.BlockSpec((nft, fc, ow), lambda b, i: (0, 0, 0)),             # W
            pl.BlockSpec((1, ow), lambda b, i: (0, 0)),                      # bias
        ],
        out_specs=pl.BlockSpec((None, to, ow), lambda b, i: (b, i, 0)),
        compiler_params=pltpu.CompilerParams(
            dimension_semantics=("parallel", "parallel"),
            vmem_limit_bytes=32 * 1024 * 1024),
    )(x_tiles, w_f, b_f)

    # un-frame (free row-major reshape), drop tile padding, patch boundaries
    y = out.reshape(B, n_of_pad * opf, cout)[:, :lout, :]
    y = _patch_boundaries(y, x_nlc.astype(jnp.float32), meta, L, lout)
    return jnp.transpose(y, (0, 2, 1))                  # back to NCL


# -------------------- deterministic parameter construction -------------------
def init_params(key, in_channels, out_channels, kernel_size, dilations):
    """Synthetic weights honoring weight_norm: W = g * v / ||v|| (norm over all
    dims except the out-channel dim)."""
    nd = len(dilations)
    ks = jax.random.split(key, 6)
    v_dil = jax.random.normal(ks[0], (nd, out_channels, in_channels, kernel_size), jnp.float32)
    g_dil = 1.0 + 0.1 * jax.random.normal(ks[1], (nd, out_channels), jnp.float32)
    b_dil = 0.1 * jax.random.normal(ks[2], (nd, out_channels), jnp.float32)
    v_proj = jax.random.normal(ks[3], (out_channels, out_channels, 3), jnp.float32)
    g_proj = 1.0 + 0.1 * jax.random.normal(ks[4], (out_channels,), jnp.float32)
    b_proj = 0.1 * jax.random.normal(ks[5], (out_channels,), jnp.float32)

    norm_d = jnp.sqrt(jnp.sum(v_dil ** 2, axis=(2, 3), keepdims=True))
    w_dil = (g_dil[:, :, None, None] / norm_d) * v_dil          # (nd, Cout, Cin, K)
    norm_p = jnp.sqrt(jnp.sum(v_proj ** 2, axis=(1, 2), keepdims=True))
    w_proj = (g_proj[:, None, None] / norm_p) * v_proj          # (Cout, Cout, 3)
    return w_dil, b_dil, w_proj, b_proj


# ------------------------- pure-JAX reference (check) ------------------------
def mdc_reference(x_ncl, torch_params, *, kernel_size, stride, dilations,
                  match_kernel_quantization=False):
    """Module semantics via lax.conv.  With match_kernel_quantization=True the
    activation is rounded to bf16 (like the kernel's x operand) but all math
    and weights stay f32."""
    w_dil, b_dil, w_proj, b_proj = torch_params
    x = x_ncl
    if match_kernel_quantization:
        x = x.astype(jnp.bfloat16).astype(jnp.float32)
    acc = 0.0
    for i, d in enumerate(dilations):
        pad = d * (kernel_size - 1) // 2
        y = lax.conv_general_dilated(
            x, w_dil[i], window_strides=(1,), padding=[(pad, pad)],
            rhs_dilation=(d,), dimension_numbers=('NCH', 'OIH', 'NCH'),
            precision=lax.Precision.HIGHEST)
        acc = acc + y + b_dil[i][None, :, None]
    acc = acc / len(dilations)
    y = lax.conv_general_dilated(
        acc, w_proj, window_strides=(stride,), padding=[(1, 1)],
        dimension_numbers=('NCH', 'OIH', 'NCH'),
        precision=lax.Precision.HIGHEST)
    y = y + b_proj[None, :, None]
    return jnp.where(y >= 0, y, LRELU_SLOPE * y)


if __name__ == "__main__":
    # small shapes consistent with the module
    B, Cin, Cout, L = 2, 4, 8, 16
    kernel_size, stride, dilations = 5, 2, [1, 2, 3]

    key = jax.random.PRNGKey(0)
    k_x, k_w = jax.random.split(key)
    x = jax.random.normal(k_x, (B, Cin, L), jnp.float32)     # PyTorch NCL layout

    torch_params = init_params(k_w, Cin, Cout, kernel_size, dilations)
    packed, meta = pack_mdc_params(torch_params, kernel_size=kernel_size,
                                   stride=stride, dilations=dilations)

    out = jax.block_until_ready(mdc_forward(x, packed, meta))

    ref = mdc_reference(x, torch_params, kernel_size=kernel_size, stride=stride,
                        dilations=dilations, match_kernel_quantization=True)
    assert out.shape == ref.shape, (out.shape, ref.shape)
    max_err = float(jnp.max(jnp.abs(out - ref)))
    assert bool(jnp.allclose(out, ref, rtol=2e-2, atol=2e-2)), max_err

    print("KERNEL_OK")
</pallas_src>

<mosaic_0001>
module attributes {stable_mosaic.version = 11 : i64} {
  func.func @_mdc_kernel(%arg0: i32, %arg1: i32, %arg2: memref<1x1x2x128xbf16, #tpu.memory_space<vmem>>, %arg3: memref<2x128x128xbf16, #tpu.memory_space<vmem>>, %arg4: memref<1x128xf32, #tpu.memory_space<vmem>>, %arg5: memref<1x1x128xf32, #tpu.memory_space<vmem>>) attributes {dimension_semantics = [#tpu.dimension_semantics<parallel>, #tpu.dimension_semantics<parallel>], iteration_bounds = array<i64: 2, 1>, scalar_prefetch = 0 : i64, scratch_operands = 0 : i64, tpu.core_type = #tpu.core_type<tc>, window_params = [{transform_indices = @transform_0, window_bounds = array<i64: 1, 1, 2, 128>}, {pipeline_mode = #tpu.pipeline_mode<synchronous>, transform_indices = @transform_1, window_bounds = array<i64: 2, 128, 128>}, {pipeline_mode = #tpu.pipeline_mode<synchronous>, transform_indices = @transform_2, window_bounds = array<i64: 1, 128>}, {transform_indices = @transform_3, window_bounds = array<i64: 1, 1, 128>}]} {
    %c0 = arith.constant 0 : index
    %c0_0 = arith.constant 0 : index
    %c0_1 = arith.constant 0 : index
    %c0_2 = arith.constant 0 : index
    %0 = vector.load %arg2[%c0, %c0_0, %c0_1, %c0_2] : memref<1x1x2x128xbf16, #tpu.memory_space<vmem>>, vector<1x1x1x128xbf16>
    %1 = vector.shape_cast %0 : vector<1x1x1x128xbf16> to vector<1x128xbf16>
    %c0_3 = arith.constant 0 : index
    %c0_4 = arith.constant 0 : index
    %c0_5 = arith.constant 0 : index
    %2 = vector.load %arg3[%c0_3, %c0_4, %c0_5] : memref<2x128x128xbf16, #tpu.memory_space<vmem>>, vector<1x128x128xbf16>
    %3 = vector.shape_cast %2 : vector<1x128x128xbf16> to vector<128x128xbf16>
    %cst = arith.constant dense<0.000000e+00> : vector<1x128xf32>
    %4 = tpu.matmul %1, %3, %cst {dimension_numbers = #tpu.dot_dimension_numbers<[1], [0], [0], [1], [0, 0, 1, 1], [], []>} : vector<1x128xbf16>, vector<128x128xbf16>, vector<1x128xf32> -> vector<1x128xf32>
    %c0_6 = arith.constant 0 : index
    %c0_7 = arith.constant 0 : index
    %c1 = arith.constant 1 : index
    %c0_8 = arith.constant 0 : index
    %5 = vector.load %arg2[%c0_6, %c0_7, %c1, %c0_8] : memref<1x1x2x128xbf16, #tpu.memory_space<vmem>>, vector<1x1x1x128xbf16>
    %6 = vector.shape_cast %5 : vector<1x1x1x128xbf16> to vector<1x128xbf16>
    %c1_9 = arith.constant 1 : index
    %c0_10 = arith.constant 0 : index
    %c0_11 = arith.constant 0 : index
    %7 = vector.load %arg3[%c1_9, %c0_10, %c0_11] : memref<2x128x128xbf16, #tpu.memory_space<vmem>>, vector<1x128x128xbf16>
    %8 = vector.shape_cast %7 : vector<1x128x128xbf16> to vector<128x128xbf16>
    %cst_12 = arith.constant dense<0.000000e+00> : vector<1x128xf32>
    %9 = tpu.matmul %6, %8, %cst_12 {dimension_numbers = #tpu.dot_dimension_numbers<[1], [0], [0], [1], [0, 0, 1, 1], [], []>} : vector<1x128xbf16>, vector<128x128xbf16>, vector<1x128xf32> -> vector<1x128xf32>
    %10 = arith.addf %4, %9 : vector<1x128xf32>
    %c0_13 = arith.constant 0 : index
    %c0_14 = arith.constant 0 : index
    %11 = vector.load %arg4[%c0_13, %c0_14] : memref<1x128xf32, #tpu.memory_space<vmem>>, vector<1x128xf32>
    %12 = arith.addf %10, %11 : vector<1x128xf32>
    %cst_15 = arith.constant 0.000000e+00 : f32
    %13 = vector.broadcast %cst_15 : f32 to vector<1x128xf32>
    %14 = arith.cmpf oge, %12, %13 : vector<1x128xf32>
    %cst_16 = arith.constant 2.000000e-01 : f32
    %15 = vector.broadcast %cst_16 : f32 to vector<1x128xf32>
    %16 = arith.mulf %15, %12 : vector<1x128xf32>
    %17 = arith.select %14, %12, %16 : vector<1x128xi1>, vector<1x128xf32>
    %c0_17 = arith.constant 0 : index
    %c0_18 = arith.constant 0 : index
    %c0_19 = arith.constant 0 : index
    %18 = vector.load %arg5[%c0_17, %c0_18, %c0_19] : memref<1x1x128xf32, #tpu.memory_space<vmem>>, vector<1x1x128xf32>
    %19 = vector.shape_cast %18 : vector<1x1x128xf32> to vector<1x128xf32>
    %20 = vector.shape_cast %17 : vector<1x128xf32> to vector<1x1x128xf32>
    tpu.vector_store %arg5[%c0_17, %c0_18, %c0_19], %20 {strides = array<i32>} : memref<1x1x128xf32, #tpu.memory_space<vmem>>, vector<1x1x128xf32>,
    return
  }
  func.func @transform_0(%arg0: i32, %arg1: i32) -> (i32, i32, i32, i32) {
    %c0_i32 = arith.constant 0 : i32
    %c0_i32_0 = arith.constant 0 : i32
    %c0_i32_1 = arith.constant 0 : i32
    return %arg0, %arg1, %c0_i32, %c0_i32_0 : i32, i32, i32, i32
  }
  func.func @transform_1(%arg0: i32, %arg1: i32) -> (i32, i32, i32) {
    %c0_i32 = arith.constant 0 : i32
    %c0_i32_0 = arith.constant 0 : i32
    %c0_i32_1 = arith.constant 0 : i32
    %c0_i32_2 = arith.constant 0 : i32
    return %c0_i32, %c0_i32_0, %c0_i32_1 : i32, i32, i32
  }
  func.func @transform_2(%arg0: i32, %arg1: i32) -> (i32, i32) {
    %c0_i32 = arith.constant 0 : i32
    %c0_i32_0 = arith.constant 0 : i32
    %c0_i32_1 = arith.constant 0 : i32
    return %c0_i32, %c0_i32_0 : i32, i32
  }
  func.func @transform_3(%arg0: i32, %arg1: i32) -> (i32, i32, i32) {
    %c0_i32 = arith.constant 0 : i32
    %c0_i32_0 = arith.constant 0 : i32
    return %arg0, %arg1, %c0_i32 : i32, i32, i32
  }
}

</mosaic_0001>

<bundles_post_ra>
// kernel: tpu_custom_call.1
= control target key start
LH: loop header
LB: loop body
LE: loop exit
PB: predicated region body
PF: predicated region fallthrough
CT: control target
= control target key end

     0   :  { %8 = vsyncpa [#allocation3], 0  ;;  %s1114_s0 = inlined_call_operand.hbm [shape: bf16[2,1,2,128], index: 0, kind: input, shape index: {}]   ;;  %s1115_s1 = inlined_call_operand.hbm [shape: bf16[2,128,128], index: 1, kind: input, shape index: {}]   ;;  %s1116_s2 = inlined_call_operand.vmem [shape: f32[1,128], index: 2, kind: input, shape index: {}]   ;;  %s1117_s3 = inlined_call_operand.hbm [shape: f32[2,1,128], index: 3, kind: output, shape index: {}]  }
   0x1   :  { %10 = vsyncpa [#allocation3 + $0x1], 0 }
   0x2   :  { %11 = vsyncpa [#allocation6], 0 }
   0x3   :  { %12 = vsyncpa [#allocation4], 0 }
   0x4   :  { %14 = vsyncpa [#allocation4 + $0x1], 0  ;;  %s900_s12 = smov 0   ;;  %s902_s13 = smov 0  }
   0x5   :  { %s904_s14 = smov 0   ;;  %s906_s15 = smov 0  }
   0x6   :  { %s908_s16 = smov 0   ;;  %s910_s17 = smov 0  }
   0x7 LB: > { %s547_s18 = sadd.s32 4294967295, %s870_s17   ;;  %s548_s19 = sadd.s32 4294967294, %s870_s17   ;;  %s870_s17 = sphi %s910_s17, %s20_s17   ;;  %s866_s16 = sphi %s908_s16, %s1140_s16   ;;  %s862_s15 = sphi %s906_s15, %s1139_s15   ;;  %s858_s14 = sphi %s904_s14, %s1138_s14   ;;  %s854_s13 = sphi %s902_s13, %s1137_s13   ;;  %s850_s12 = sphi %s900_s12, %s1136_s12  }
   0x8   : > { %p54_p0 = scmp.ne.s32.totalorder %s854_s13, %s850_s12  ;;  %p934_p1 = scmp.eq.s32.totalorder %s547_s18, 0 }
   0x9   : > { %p938_p2 = scmp.eq.s32.totalorder %s547_s18, 1  ;;  %p128_p3 = scmp.eq.s32.totalorder %s548_s19, 1 }
   0xa   : > { %s1122_s20 = scalar_select %p934_p1, 1, 0 }
   0xb   : > { %s1123_s21 = scalar_select %p938_p2, 1, 0 }
   0xc   : > { %p944_p4 = por %p934_p1, %p54_p0  ;;  %p549_p5 = scmp.ge.s32.totalorder %s870_s17, 1 }
   0xd   : > { %p949_p6 = por %p128_p3, %p54_p0  ;;  %p135_p7 = scmp.lt.s32.totalorder %s870_s17, 3 }
   0xe   : > { %s1124_s22 = scalar_select %p944_p4, 1, 0 }
   0xf   : > { %s1125_s23 = scalar_select %p949_p6, 1, 0 }
  0x10   : > { %p954_p8 = pnand %p549_p5, %p135_p7  ;;  %s872_s25 = smov [#allocation5]  }
  0x11   : > { %s147_s26 = sshll.u32 %s872_s25, 4  ;;  %s32_s28 = sadd.s32 1, %s866_s16  ;;  %s148_s26 = int_to_ptr.vmem [resolvable:$true] %s147_s26 }
  0x12   : > { %s1126_s24 = scalar_select %p954_p8, 1, 0 }
  0x13   : > { %p640_p9 = pneg %p954_p8  ;;  %s726_s4 = scalar_lea.hbm %s1115_s1, 2048 }
  0x14   : > { %p727_p12 = scmp.ne.s32.totalorder %s1115_s1, %s726_s4  ;;  %p733_p5 = scmp.lt.u32.totalorder %s726_s4, %s1115_s1 }
  0x15   : > { %p963_p11 = pnand %p640_p9, %p934_p1 }
  0x17   : > { %p728_p13 = pneg %p963_p11 }
  0x19   : > { %p729_p0 = pnand %p728_p13, %p727_p12 }
  0x1b   : > { %p730_p3 = pneg %p729_p0 }
  0x1d   : > { %p735_p7 = pnand %p733_p5, %p730_p3 }
  0x1f   : > { %738 = shalt.err (!%p735_p7)
}
  0x20   : > { %s739_s9 = scalar_lea.vmem %s148_s26, 2048  ;;  %p747_p1 = scmp.lt.s32.totalorder %s148_s26, %s148_s26 }
  0x21   : > { %p740_p9 = scmp.ne.s32.totalorder %s148_s26, %s739_s9  ;;  %p748_p4 = scmp.lt.s32.totalorder %s739_s9, %s739_s9 }
  0x23   : > { %p742_p10 = pnand %p740_p9, %p728_p13  ;;  %p749_p8 = por %p748_p4, %p747_p1 }
  0x25   : > { %p743_p6 = pneg %p742_p10 }
  0x27   : > { %p750_p2 = pnand %p749_p8, %p743_p6 }
  0x29   : > { %753 = shalt.err (!%p750_p2)
}
  0x2a   : > { %s873_s10 = smov 64   ;;  %s874_s11 = smov 4  }
  0x2b   : > { %643 = dma.hbm_to_vmem [thread:$0]  (!%p963_p11), %s1115_s1, 2048, %s148_s26, [#allocation6], %s873_s10, %s873_s10, %s874_s11  }
  0x2c   : > { %p34_p1 = scmp.ge.s32.totalorder %s32_s28, 2  ;;  %p48_p2 = scmp.ne.s32.totalorder %s858_s14, %s854_s13 }
  0x2d   : > { %p49_p4 = scmp.eq.s32.totalorder %s870_s17, 0  ;;  %s41_s25 = sadd.s32 1, %s858_s14 }
  0x2e   : > { %s1142_s28 = smov (%p34_p1, %s32_s28), 0  ;;  %p1128_p6 = scmp.ne.s32.totalorder %s1123_s21, 0 }
  0x2f   : > { %s36_s30 = ssub.s32 %s866_s16, %s1142_s28  ;;  %p50_p10 = por %p49_p4, %p48_p2 }
  0x30   : > { %p992_p8 = por %p1128_p6, %p48_p2  ;;  %p39_p12 = scmp.eq.s32.totalorder %s36_s30, 0 }
  0x31   : > { %s164_s27 = sand.u32 1, %s858_s14   ;;  %p653_p13 = scmp.lt.s32.totalorder %s870_s17, 2 }
  0x32   : > { %s1001_s4 = scalar_select %p39_p12, %s858_s14, %s41_s25  }
  0x33   : > { %s552_s26 = sshll.u32 %s866_s16, 4  ;;  %s167_s5 = scalar_lea.vmem [#allocation2], %s164_s27 }
  0x34   : > { %s175_s6 = sshll.u32 %s167_s5, 4  ;;  %s1007_s9 = scalar_lea.hbm %s1114_s0, %s552_s26  ;;  %s1009_s6 = int_to_ptr.vmem [resolvable:$true] %s175_s6 }
  0x35   : > { %p1011_p11 = pnand %p653_p13, %p50_p10  ;;  %s165_s10 = scalar_lea.sflag [#allocation3], %s164_s27 }
  0x36   : > { %s754_s11 = scalar_lea.hbm %s1007_s9, 16  ;;  %s759_s25 = scalar_lea.hbm %s1114_s0, 32 }
  0x37   : > { %p755_p0 = scmp.ne.s32.totalorder %s1007_s9, %s754_s11  ;;  %p756_p3 = pneg %p1011_p11 }
  0x38   : > { %p760_p9 = scmp.lt.u32.totalorder %s1007_s9, %s1114_s0  ;;  %p761_p1 = scmp.lt.u32.totalorder %s759_s25, %s754_s11 }
  0x39   : > { %p757_p5 = pnand %p756_p3, %p755_p0  ;;  %p763_p4 = scmp.lt.u32.totalorder %s754_s11, %s1007_s9 }
  0x3a   : > { %p762_p2 = por %p761_p1, %p760_p9 }
  0x3b   : > { %p758_p7 = pneg %p757_p5 }
  0x3c   : > { %p764_p6 = por %p763_p4, %p762_p2 }
  0x3e   : > { %p765_p10 = pnand %p764_p6, %p758_p7 }
  0x40   : > { %768 = shalt.err (!%p765_p10)
}
  0x41   : > { %s769_s27 = scalar_lea.vmem %s1009_s6, 16  ;;  %s875_s5 = smov [#allocation2]  }
  0x42   : > { %p770_p12 = scmp.ne.s32.totalorder %s1009_s6, %s769_s27  ;;  %s774_s7 = sshll.u32 %s875_s5, 4  ;;  %s775_s7 = int_to_ptr.vmem [resolvable:$false] %s774_s7 }
  0x43   : > { %s776_s8 = scalar_lea.vmem %s775_s7, 32  ;;  %p777_p5 = scmp.lt.s32.totalorder %s1009_s6, %s775_s7 }
  0x44   : > { %p772_p13 = pnand %p770_p12, %p756_p3  ;;  %p778_p9 = scmp.lt.s32.totalorder %s776_s8, %s769_s27 }
  0x46   : > { %p773_p0 = pneg %p772_p13  ;;  %p779_p1 = por %p778_p9, %p777_p5 }
  0x48   : > { %p780_p2 = pnand %p779_p1, %p773_p0 }
  0x4a   : > { %783 = shalt.err (!%p780_p2)
}
  0x4b   : > { %647 = dma.hbm_to_vmem [thread:$0]  (!%p1011_p11), %s1007_s9, 16, %s1009_s6, %s165_s10  }
  0x4c   : > { %p1131_p7 = scmp.ne.s32.totalorder %s1126_s24, 0 }
  0x4d   : > { %s1043_s11 = sand.u32 (!%p1131_p7), 1, %s854_s13   ;;  %p1132_p3 = scmp.ne.s32.totalorder (!%p1131_p7), %s1124_s22, 0 }
  0x4e   : > { %184 = sbr.rel (%p1131_p7) target bundleno = 356 (0x164), region = 32  ;;  %s187_s18 = scalar_lea.sflag (!%p1131_p7), [#allocation3], %s1043_s11 }
  0x4f   : > { %s189_s19 = scalar_lea.vmem (!%p1131_p7), [#allocation2], %s1043_s11 }
  0x55   : > { %837 = dma.done.wait (%p1132_p3), %s187_s18, 16  }
  0x56   : > { %839 = vsyncadd (%p1132_p3), %s187_s18, 4294967280  ;;  %p1133_p4 = scmp.ne.s32.totalorder %s1122_s20, 0 }
  0x58   : > { %841 = dma.done.wait (%p1133_p4), [#allocation6], 2048  }
  0x59   : > { %843 = vsyncadd (%p1133_p4), [#allocation6], 4294965248  ;;  %v876_v0 = vmov 0.0   ;;  %vm877_vm0 = vmmov 0   ;;  %v710_v1 = vld [vmem:[#allocation5 + $0x40] sm:$0xff]   ;;  %v712_v3 = vld [vmem:[#allocation5 + $0x48] sm:$0xff]   ;;  %v253_v9 = vlaneseq }
  0x5a   : > { %592 = vmatprep.subr.bf16.mxu0 %v876_v0  ;;  %612 = vmatprep.subr.bf16.mxu1 %v876_v0  ;;  %v711_v2 = vld [vmem:[#allocation5] sm:$0xff]   ;;  %v713_v4 = vld [vmem:[#allocation5 + $0x8] sm:$0xff]   ;;  %v714_v5 = vld [vmem:[#allocation5 + $0x50] sm:$0xff]   ;;  %v878_v7 = vmov 1966171168   ;;  %s571_s24 = sshll.u32 %s862_s15, 4 }
  0x5b   : > { %608 = vmatprep.mubr.msk.bf16.mxu0 %vm877_vm0, %v876_v0  ;;  %628 = vmatprep.mubr.msk.bf16.mxu1 %vm877_vm0, %v876_v0  ;;  %v715_v6 = vld [vmem:[#allocation5 + $0x10] sm:$0xff]   ;;  %v251_v8 = vunpack.c.l.s4 %v878_v7  ;;  %v716_v10 = vld [vmem:[#allocation5 + $0x58] sm:$0xff]   ;;  %v254_v13 = vshrl.u32 %v253_v9, 7  ;;  %v718_v14 = vld [vmem:[#allocation5 + $0x60] sm:$0xff]   ;;  %s213_s6 = scalar_lea.vmem [#allocation7], %s1043_s11  ;;  %s1065_s25 = scalar_lea.hbm %s1117_s3, %s571_s24 }
  0x5c   : > { %593 = vmatpush3.bf16.msra.mxu0 %v710_v1  ;;  %613 = vmatpush3.bf16.msra.mxu1 %v711_v2  ;;  %v717_v11 = vld [vmem:[#allocation5 + $0x18] sm:$0xff]   ;;  %v719_v15 = vld [vmem:[#allocation5 + $0x20] sm:$0xff]   ;;  %v720_v17 = vld [vmem:[#allocation5 + $0x68] sm:$0xff]   ;;  %s464_s9 = sshll.u32 %s213_s6, 4  ;;  %s451_s30 = scalar_lea.sflag [#allocation4], %s1043_s11  ;;  %s1067_s9 = int_to_ptr.vmem [resolvable:$true] %s464_s9 }
  0x5d   : > { %594 = vmatprep.subr.bf16.mxu0 %v876_v0  ;;  %614 = vmatprep.subr.bf16.mxu1 %v876_v0  ;;  %v252_v12 = vunpack.c.0.s8 %v251_v8  ;;  %v215_v18 = vld [vmem:[%s189_s19] sm:$0x1]  ;;  %v721_v19 = vld [vmem:[#allocation5 + $0x28] sm:$0xff]   ;;  %v722_v21 = vld [vmem:[#allocation5 + $0x70] sm:$0xff]   ;;  %s784_s26 = scalar_lea.vmem %s1067_s9, 16  ;;  %s879_s15 = smov [#allocation7]  }
  0x5e   : > { %v723_v22 = vld [vmem:[#allocation5 + $0x30] sm:$0xff]   ;;  %v724_v24 = vld [vmem:[#allocation5 + $0x78] sm:$0xff]   ;;  %p785_p11 = scmp.ne.s32.totalorder %s1067_s9, %s784_s26  ;;  %s788_s27 = sshll.u32 %s879_s15, 4  ;;  %s789_s27 = int_to_ptr.vmem [resolvable:$false] %s788_s27 }
  0x5f   : > { %v255_v16 = vsub.s32 %v252_v12, %v254_v13  ;;  %v725_v25 = vld [vmem:[#allocation5 + $0x38] sm:$0xff]   ;;  %s790_s5 = scalar_lea.vmem %s789_s27, 32  ;;  %p791_p12 = scmp.lt.s32.totalorder %s1067_s9, %s789_s27 }
  0x60   : > { %595 = vmatpush3.bf16.msra.mxu0 %v712_v3  ;;  %615 = vmatpush3.bf16.msra.mxu1 %v713_v4  ;;  %v444_v29 = vld [vmem:[%s1116_s2] sm:$0x1]  ;;  %p786_p6 = pnand %p785_p11, %p992_p8  ;;  %p792_p13 = scmp.lt.s32.totalorder %s790_s5, %s784_s26 }
  0x61   : > { %596 = vmatprep.subr.bf16.mxu0 %v876_v0  ;;  %616 = vmatprep.subr.bf16.mxu1 %v876_v0  ;;  %v256_v20 = vrot.slane %v215_v18, %v255_v16 }
  0x62   : > { %p787_p10 = pneg %p786_p6  ;;  %p793_p0 = por %p792_p13, %p791_p12 }
  0x63   : > { %v263_v23 = vrot.slane %v256_v20, %v255_v16 }
  0x64   : > { %597 = vmatpush3.bf16.msra.mxu0 %v714_v5  ;;  %617 = vmatpush3.bf16.msra.mxu1 %v715_v6  ;;  %p794_p5 = pnand %p793_p0, %p787_p10 }
  0x65   : > { %598 = vmatprep.subr.bf16.mxu0 %v876_v0  ;;  %618 = vmatprep.subr.bf16.mxu1 %v876_v0  ;;  %v265_v26 = vshrl.u32 %v263_v23, 16 }
  0x68   : > { %599 = vmatpush3.bf16.msra.mxu0 %v716_v10  ;;  %619 = vmatpush3.bf16.msra.mxu1 %v717_v11 }
  0x69   : > { %600 = vmatprep.subr.bf16.mxu0 %v876_v0  ;;  %620 = vmatprep.subr.bf16.mxu1 %v876_v0 }
  0x6c   : > { %601 = vmatpush3.bf16.msra.mxu0 %v718_v14  ;;  %621 = vmatpush3.bf16.msra.mxu1 %v719_v15 }
  0x6d   : > { %602 = vmatprep.subr.bf16.mxu0 %v876_v0  ;;  %622 = vmatprep.subr.bf16.mxu1 %v876_v0 }
  0x70   : > { %603 = vmatpush3.bf16.msra.mxu0 %v720_v17  ;;  %623 = vmatpush3.bf16.msra.mxu1 %v721_v19 }
  0x71   : > { %604 = vmatprep.subr.bf16.mxu0 %v876_v0  ;;  %624 = vmatprep.subr.bf16.mxu1 %v876_v0 }
  0x74   : > { %605 = vmatpush3.bf16.msra.mxu0 %v722_v21  ;;  %625 = vmatpush3.bf16.msra.mxu1 %v723_v22 }
  0x75   : > { %606 = vmatprep.subr.bf16.mxu0 %v876_v0  ;;  %626 = vmatprep.subr.bf16.mxu1 %v876_v0 }
  0x78   : > { %607 = vmatpush3.bf16.msra.mxu0 %v724_v24  ;;  %627 = vmatpush3.bf16.msra.mxu1 %v725_v25 }
  0x7b   : > { %609 = vmatmul.mubr.bf16.vlgmr.msra.gmra.mrb[0].mxu0 %v265_v26  ;;  %629 = vmatmul.mubr.bf16.vlgmr.msra.gmra.mrb[0].mxu1 %v215_v18 }
 0x14e   : > { %v350_v27 = vpop.f32.mrb[0].mxu0  ;;  %v438_v28 = vpop.f32.mrb[0].mxu1 }
 0x14f   : > { %v610_v30 = vpop.f32.mrb[1].mxu0  ;;  %v439_v31 = vadd.f32 %v438_v28, %v350_v27  ;;  %v630_v32 = vpop.f32.mrb[1].mxu1 }
 0x150   : > { %v353_v33 = vpop.f32.mrb[2].mxu0  ;;  %v441_v34 = vpop.f32.mrb[2].mxu1 }
 0x151   : > { %v611_v35 = vpop.f32.mrb[3].mxu0  ;;  %v445_v36 = vadd.f32 %v444_v29, %v439_v31  ;;  %v631_v37 = vpop.f32.mrb[3].mxu1 }
 0x153   : > { %vm446_vm1 = vcmp.ge.f32.partialorder %v445_v36, 0.0  ;;  %v447_v38 = vmul.f32 0.2, %v445_v36 }
 0x155   : > { %v448_v39 = vsel %vm446_vm1, %v445_v36, %v447_v38 }
 0x156   : > { %449 = vst [vmem:[%s213_s6] sm:$0x1] %v448_v39 }
 0x157   : > { %797 = shalt.err (!%p794_p5)
}
 0x158   : > { %s798_s7 = scalar_lea.hbm %s1065_s25, 16  ;;  %s802_s18 = scalar_lea.hbm %s1117_s3, 32 }
 0x159   : > { %p799_p9 = scmp.ne.s32.totalorder %s1065_s25, %s798_s7  ;;  %p803_p7 = scmp.lt.u32.totalorder %s1065_s25, %s1117_s3 }
 0x15a   : > { %p804_p3 = scmp.lt.u32.totalorder %s802_s18, %s798_s7  ;;  %p806_p11 = scmp.lt.u32.totalorder %s798_s7, %s1065_s25 }
 0x15b   : > { %p800_p1 = pnand %p799_p9, %p992_p8 }
 0x15c   : > { %p805_p4 = por %p804_p3, %p803_p7 }
 0x15d   : > { %p801_p2 = pneg %p800_p1 }
 0x15e   : > { %p807_p6 = por %p806_p11, %p805_p4 }
 0x160   : > { %p808_p10 = pnand %p807_p6, %p801_p2 }
 0x162   : > { %811 = shalt.err (!%p808_p10)
}
 0x163   : > { %638 = dma.vmem_to_hbm [thread:$0]  (%p992_p8), %s1067_s9, 16, %s1065_s25, %s451_s30  }
 0x164 PF: > { %s476_s22 = sand.u32 1, %s850_s12   ;;  %p1134_p12 = scmp.ne.s32.totalorder %s1125_s23, 0 }
 0x165   : > { %p1135_p13 = scmp.ge.s32.totalorder %s870_s17, 2  ;;  %s477_s24 = scalar_lea.sflag [#allocation4], %s476_s22 }
 0x167   : > { %p649_p0 = pnand %p1135_p13, %p1134_p12 }
 0x169   : > { %845 = dma.done.wait (!%p649_p0), %s477_s24, 16  }
 0x16a   : > { %847 = vsyncadd (!%p649_p0), %s477_s24, 4294967280  ;;  %s20_s17 = sadd.s32 1, %s870_s17   ;;  %s1136_s12 = smov %s854_s13 }
 0x16b   : > { %p17_p5 = scmp.ge.s32.totalorder %s20_s17, 4   ;;  %s1137_s13 = smov %s858_s14 }
 0x16c   : > { %s1138_s14 = smov %s1001_s4  ;;  %s1139_s15 = smov %s866_s16 }
 0x16d   : > { %s1140_s16 = smov %s1142_s28  ;;  %19 = sbr.rel (!%p17_p5) target bundleno = 7 (0x7), region = 82 }
 0x174   :  { %481 = vsyncpa [#allocation3], 1 }
 0x175   :  { %483 = vsyncpa [#allocation3 + $0x1], 1 }
 0x176   :  { %484 = vsyncpa [#allocation6], 1 }
 0x177   :  { %485 = vsyncpa [#allocation4], 1 }
 0x178   :  { %487 = vsyncpa [#allocation4 + $0x1], 1 }

</bundles_post_ra>
